<compile_context>
chip_gen: v6e
topology: v6e:2x2x1
jax: 0.10.0
libtpu: 0.0.40
codegen_flags: <defaults>
</compile_context>

<pallas_src>
import functools

import jax
import jax.numpy as jnp
from jax.experimental import pallas as pl
from jax.experimental.pallas import tpu as pltpu


def resblock_kernel(x_ref, t1_ref, t2_ref, b_ref, out_ref, *, img_rows):
    """Fused ResBlock forward for one block of lane-packed images.

    x_ref  : (M, L)    M = (#image groups in block) * H rows, L = P*W*C lanes
    t1_ref : (3L, L)   conv1 block-Toeplitz weights, kh taps stacked along K,
                       BN1 scale folded into the columns
    t2_ref : (3L, L)   conv2 weights (BN2 scale folded)
    b_ref  : (2, L)    rows = [bias1, bias2] (folded BN biases)
    out_ref: (M, L)
    """
    x = x_ref[...]                                  # (M, L)
    m = x.shape[0]
    xf = x.astype(jnp.float32)                      # residual in f32

    # Per-image H-boundary masks: zero the rows a 'same' conv would pad.
    # Handles both the roll wrap-around at the block edge and interior image
    # boundaries when several images share one block.
    row = jax.lax.broadcasted_iota(jnp.int32, x.shape, 0) % img_rows
    not_top = row != 0
    not_bot = row != (img_rows - 1)

    def conv3x3(inp, t_ref):
        # 'same' 3x3 conv as a SINGLE MXU matmul: W padding is baked into the
        # block-Toeplitz weights; the three kh taps are stacked along K and the
        # matching H shifts are applied to the input (XLU roll + VPU select).
        down = jnp.where(not_top, pltpu.roll(inp, shift=1, axis=0), 0.0)      # row h <- h-1
        up = jnp.where(not_bot, pltpu.roll(inp, shift=m - 1, axis=0), 0.0)    # row h <- h+1
        x3 = jnp.concatenate([down, inp, up], axis=-1)                        # (M, 3L)
        return jnp.dot(x3, t_ref[...], preferred_element_type=jnp.float32)

    b1 = b_ref[0:1, :]
    b2 = b_ref[1:2, :]

    # conv1 (BN1 scale folded into weights) -> +bias1 -> relu
    h1 = jnp.maximum(conv3x3(x, t1_ref) + b1, 0.0)
    # conv2 (BN2 scale folded) -> +bias2 -> +residual -> relu
    y = conv3x3(h1.astype(x.dtype), t2_ref) + b2 + xf
    out_ref[...] = jnp.maximum(y, 0.0).astype(out_ref.dtype)


def _fold_bn(bn, eps):
    s = bn["gamma"] / jnp.sqrt(bn["var"] + eps)
    b = bn["beta"] - bn["mean"] * s
    return s, b


def _packed_toeplitz(w, W, P, scale):
    """Conv weight (Cout, Cin, 3, 3) -> (3*P*W*Cin, P*W*Cout) matmul operand.

    Per kh block: T[wi*Cin+ci, wo*Cout+co] = w[co,ci,kh,kw] * scale[co] with
    wi = wo + kw - 1 and zero outside [0, W)  ->  'same' padding along W.
    The P-image lane packing is block-diagonal (kron with eye(P)); the three
    kh blocks are stacked along K to match the [rolled-down, center, rolled-up]
    inputs concatenated along the lane axis inside the kernel.
    """
    Cout, Cin, _, _ = w.shape
    wt = (jnp.transpose(w, (2, 3, 1, 0)).astype(jnp.float32)
          * scale.astype(jnp.float32)[None, None, None, :])      # (kh, kw, Cin, Cout)
    eye_p = jnp.eye(P, dtype=jnp.float32)
    mats = []
    for kh in range(3):
        t = jnp.zeros((W * Cin, W * Cout), jnp.float32)
        for kw in range(3):
            shift = jnp.eye(W, W, k=1 - kw, dtype=jnp.float32)   # wi -> wo map
            t = t + jnp.kron(shift, wt[kh, kw])
        mats.append(jnp.kron(eye_p, t))                          # block-diag pack
    return jnp.concatenate(mats, axis=0)                         # (3*P*W*Cin, P*W*Cout)


def resblock_forward(x_nchw, w1, bn1, w2, bn2, eps=1e-5,
                     use_bf16=False, max_groups_per_step=8):
    """x_nchw: (N, Cin, H, W); w1: (Cout, Cin, 3, 3); w2: (Cout, Cout, 3, 3)."""
    N, Cin, H, W = x_nchw.shape
    Cout = w1.shape[0]
    assert Cin == Cout, "residual add requires in_channels == out_channels"

    # Pack P images side-by-side along the lane axis so lane width is a
    # multiple of 128 (unmasked stores, full MXU N dimension).
    wc = W * Cin
    P = 128 // wc if (wc < 128 and 128 % wc == 0) else 1
    n_pad = ((N + P - 1) // P) * P
    if n_pad != N:
        x_nchw = jnp.concatenate(
            [x_nchw, jnp.zeros((n_pad - N,) + x_nchw.shape[1:], x_nchw.dtype)], 0)
    ngroups = n_pad // P
    L = P * W * Cin

    # NCHW -> lane-dense (ngroups*H, P*W*C): images of one group side by side.
    xf = jnp.transpose(x_nchw, (0, 2, 3, 1)).astype(jnp.float32)
    xf = xf.reshape(ngroups, P, H, W * Cin)
    xf = jnp.transpose(xf, (0, 2, 1, 3)).reshape(ngroups * H, L)

    # Fold inference-mode BN: scales into weight columns, biases into (2, L).
    s1, b1 = _fold_bn(bn1, eps)
    s2, b2 = _fold_bn(bn2, eps)
    t1 = _packed_toeplitz(w1, W, P, s1)                           # (3L, L)
    t2 = _packed_toeplitz(w2, W, P, s2)                           # (3L, L)
    bias = jnp.stack([jnp.tile(b1, P * W), jnp.tile(b2, P * W)],
                     axis=0).astype(jnp.float32)                  # (2, L)

    in_dtype = jnp.bfloat16 if use_bf16 else jnp.float32
    xf = xf.astype(in_dtype)
    t1 = t1.astype(in_dtype)
    t2 = t2.astype(in_dtype)

    # Batch several image groups per grid step to raise the MXU M dimension.
    B = 1
    for cand in range(min(ngroups, max_groups_per_step), 0, -1):
        if ngroups % cand == 0:
            B = cand
            break
    m_blk = B * H

    out_flat = pl.pallas_call(
        functools.partial(resblock_kernel, img_rows=H),
        out_shape=jax.ShapeDtypeStruct((ngroups * H, L), jnp.float32),
        grid_spec=pltpu.PrefetchScalarGridSpec(
            num_scalar_prefetch=0,
            grid=(ngroups // B,),
            in_specs=[
                pl.BlockSpec((m_blk, L), lambda i: (i, 0)),
                pl.BlockSpec((3 * L, L), lambda i: (0, 0)),
                pl.BlockSpec((3 * L, L), lambda i: (0, 0)),
                pl.BlockSpec((2, L), lambda i: (0, 0)),
            ],
            out_specs=pl.BlockSpec((m_blk, L), lambda i: (i, 0)),
        ),
        compiler_params=pltpu.CompilerParams(
            dimension_semantics=("parallel",)),
    )(xf, t1, t2, bias)

    # (ngroups*H, P*W*Cout) -> NCHW, drop batch padding.
    out = out_flat.reshape(ngroups, H, P, W, Cout)
    out = jnp.transpose(out, (0, 2, 1, 3, 4)).reshape(n_pad, H, W, Cout)
    return jnp.transpose(out, (0, 3, 1, 2))[:N]


def _reference(x_nchw, w1, bn1, w2, bn2, eps=1e-5):
    """Pure-JAX reference (lax conv) matching PyTorch eval-mode semantics."""
    def conv(x, w):
        return jax.lax.conv_general_dilated(
            x, w, window_strides=(1, 1), padding=((1, 1), (1, 1)),
            dimension_numbers=("NCHW", "OIHW", "NCHW"))

    def bn(x, p):
        s = p["gamma"] / jnp.sqrt(p["var"] + eps)
        b = p["beta"] - p["mean"] * s
        return x * s[None, :, None, None] + b[None, :, None, None]

    out = jax.nn.relu(bn(conv(x_nchw, w1), bn1))
    out = bn(conv(out, w2), bn2) + x_nchw
    return jax.nn.relu(out)


if __name__ == "__main__":
    key = jax.random.PRNGKey(0)
    N, C, H, W = 2, 4, 16, 16  # in_channels == out_channels for the residual

    ks = jax.random.split(key, 11)
    x = jax.random.normal(ks[0], (N, C, H, W), jnp.float32)
    w1 = jax.random.normal(ks[1], (C, C, 3, 3), jnp.float32) * 0.1
    w2 = jax.random.normal(ks[2], (C, C, 3, 3), jnp.float32) * 0.1
    bn1 = dict(
        gamma=1.0 + 0.1 * jax.random.normal(ks[3], (C,), jnp.float32),
        beta=0.1 * jax.random.normal(ks[4], (C,), jnp.float32),
        mean=0.1 * jax.random.normal(ks[5], (C,), jnp.float32),
        var=1.0 + 0.1 * jax.random.uniform(ks[6], (C,), jnp.float32),
    )
    bn2 = dict(
        gamma=1.0 + 0.1 * jax.random.normal(ks[7], (C,), jnp.float32),
        beta=0.1 * jax.random.normal(ks[8], (C,), jnp.float32),
        mean=0.1 * jax.random.normal(ks[9], (C,), jnp.float32),
        var=1.0 + 0.1 * jax.random.uniform(ks[10], (C,), jnp.float32),
    )

    out = resblock_forward(x, w1, bn1, w2, bn2)
    out = jax.block_until_ready(out)

    ref = jax.block_until_ready(_reference(x, w1, bn1, w2, bn2))
    assert out.shape == (N, C, H, W)
    assert jnp.allclose(out, ref, rtol=1e-4, atol=1e-4), (
        f"max abs diff {jnp.max(jnp.abs(out - ref))}")

    print("KERNEL_OK")
</pallas_src>

<mosaic_0001>
module attributes {stable_mosaic.version = 11 : i64} {
  func.func @resblock_kernel(%arg0: i32, %arg1: memref<16x128xf32, #tpu.memory_space<vmem>>, %arg2: memref<384x128xf32, #tpu.memory_space<vmem>>, %arg3: memref<384x128xf32, #tpu.memory_space<vmem>>, %arg4: memref<2x128xf32, #tpu.memory_space<vmem>>, %arg5: memref<16x128xf32, #tpu.memory_space<vmem>>) attributes {dimension_semantics = [#tpu.dimension_semantics<parallel>], iteration_bounds = array<i64: 1>, scalar_prefetch = 0 : i64, scratch_operands = 0 : i64, tpu.core_type = #tpu.core_type<tc>, window_params = [{transform_indices = @transform_0, window_bounds = array<i64: 16, 128>}, {pipeline_mode = #tpu.pipeline_mode<synchronous>, transform_indices = @transform_1, window_bounds = array<i64: 384, 128>}, {pipeline_mode = #tpu.pipeline_mode<synchronous>, transform_indices = @transform_2, window_bounds = array<i64: 384, 128>}, {pipeline_mode = #tpu.pipeline_mode<synchronous>, transform_indices = @transform_3, window_bounds = array<i64: 2, 128>}, {transform_indices = @transform_4, window_bounds = array<i64: 16, 128>}]} {
    %c0 = arith.constant 0 : index
    %c0_0 = arith.constant 0 : index
    %0 = vector.load %arg1[%c0, %c0_0] : memref<16x128xf32, #tpu.memory_space<vmem>>, vector<16x128xf32>
    %1 = tpu.iota {dimensions = array<i32: 0>} : vector<16x128xi32>
    %c16_i32 = arith.constant 16 : i32
    %c0_i32 = arith.constant 0 : i32
    %2 = arith.cmpi eq, %c16_i32, %c0_i32 : i32
    %c1_i32 = arith.constant 1 : i32
    %3 = arith.select %2, %c1_i32, %c16_i32 : i32
    %4 = vector.broadcast %3 : i32 to vector<16x128xi32>
    %5 = arith.remsi %1, %4 : vector<16x128xi32>
    %c0_i32_1 = arith.constant 0 : i32
    %6 = vector.broadcast %c0_i32_1 : i32 to vector<16x128xi32>
    %7 = arith.cmpi ne, %5, %6 : vector<16x128xi32>
    %c0_i32_2 = arith.constant 0 : i32
    %8 = vector.broadcast %c0_i32_2 : i32 to vector<16x128xi32>
    %9 = arith.cmpi slt, %5, %8 : vector<16x128xi32>
    %c0_i32_3 = arith.constant 0 : i32
    %10 = arith.cmpi slt, %3, %c0_i32_3 : i32
    %11 = vector.broadcast %10 : i1 to vector<16x128xi1>
    %12 = vector.broadcast %11 : vector<16x128xi1> to vector<16x128xi1>
    %13 = arith.xori %9, %12 : vector<16x128xi1>
    %14 = arith.andi %13, %7 : vector<16x128xi1>
    %15 = vector.broadcast %3 : i32 to vector<16x128xi32>
    %16 = arith.addi %5, %15 : vector<16x128xi32>
    %17 = arith.select %14, %16, %5 : vector<16x128xi1>, vector<16x128xi32>
    %c0_i32_4 = arith.constant 0 : i32
    %18 = vector.broadcast %c0_i32_4 : i32 to vector<16x128xi32>
    %19 = arith.cmpi ne, %17, %18 : vector<16x128xi32>
    %c15_i32 = arith.constant 15 : i32
    %20 = vector.broadcast %c15_i32 : i32 to vector<16x128xi32>
    %21 = arith.cmpi ne, %17, %20 : vector<16x128xi32>
    %c0_5 = arith.constant 0 : index
    %c0_6 = arith.constant 0 : index
    %22 = vector.load %arg4[%c0_5, %c0_6] : memref<2x128xf32, #tpu.memory_space<vmem>>, vector<1x128xf32>
    %c1 = arith.constant 1 : index
    %c0_7 = arith.constant 0 : index
    %23 = vector.load %arg4[%c1, %c0_7] : memref<2x128xf32, #tpu.memory_space<vmem>>, vector<1x128xf32>
    %c1_i32_8 = arith.constant 1 : i32
    %24 = tpu.dynamic_rotate %0 by %c1_i32_8 dim 0 : vector<16x128xf32>, i32 -> vector<16x128xf32>
    %cst = arith.constant 0.000000e+00 : f32
    %25 = vector.broadcast %cst : f32 to vector<16x128xf32>
    %26 = arith.select %19, %24, %25 : vector<16x128xi1>, vector<16x128xf32>
    %c15_i32_9 = arith.constant 15 : i32
    %27 = tpu.dynamic_rotate %0 by %c15_i32_9 dim 0 : vector<16x128xf32>, i32 -> vector<16x128xf32>
    %cst_10 = arith.constant 0.000000e+00 : f32
    %28 = vector.broadcast %cst_10 : f32 to vector<16x128xf32>
    %29 = arith.select %21, %27, %28 : vector<16x128xi1>, vector<16x128xf32>
    %30 = tpu.concatenate %26, %0, %29 in 1 : vector<16x128xf32>, vector<16x128xf32>, vector<16x128xf32> -> vector<16x384xf32>
    %c0_11 = arith.constant 0 : index
    %c0_12 = arith.constant 0 : index
    %31 = vector.load %arg2[%c0_11, %c0_12] : memref<384x128xf32, #tpu.memory_space<vmem>>, vector<384x128xf32>
    %cst_13 = arith.constant dense<0.000000e+00> : vector<16x128xf32>
    %32 = tpu.matmul %30, %31, %cst_13 {dimension_numbers = #tpu.dot_dimension_numbers<[1], [0], [0], [1], [0, 0, 1, 1], [], []>} : vector<16x384xf32>, vector<384x128xf32>, vector<16x128xf32> -> vector<16x128xf32>
    %33 = vector.broadcast %22 : vector<1x128xf32> to vector<16x128xf32>
    %34 = arith.addf %32, %33 : vector<16x128xf32>
    %cst_14 = arith.constant 0.000000e+00 : f32
    %35 = vector.broadcast %cst_14 : f32 to vector<16x128xf32>
    %36 = arith.maximumf %34, %35 : vector<16x128xf32>
    %c1_i32_15 = arith.constant 1 : i32
    %37 = tpu.dynamic_rotate %36 by %c1_i32_15 dim 0 : vector<16x128xf32>, i32 -> vector<16x128xf32>
    %cst_16 = arith.constant 0.000000e+00 : f32
    %38 = vector.broadcast %cst_16 : f32 to vector<16x128xf32>
    %39 = arith.select %19, %37, %38 : vector<16x128xi1>, vector<16x128xf32>
    %c15_i32_17 = arith.constant 15 : i32
    %40 = tpu.dynamic_rotate %36 by %c15_i32_17 dim 0 : vector<16x128xf32>, i32 -> vector<16x128xf32>
    %cst_18 = arith.constant 0.000000e+00 : f32
    %41 = vector.broadcast %cst_18 : f32 to vector<16x128xf32>
    %42 = arith.select %21, %40, %41 : vector<16x128xi1>, vector<16x128xf32>
    %43 = tpu.concatenate %39, %36, %42 in 1 : vector<16x128xf32>, vector<16x128xf32>, vector<16x128xf32> -> vector<16x384xf32>
    %c0_19 = arith.constant 0 : index
    %c0_20 = arith.constant 0 : index
    %44 = vector.load %arg3[%c0_19, %c0_20] : memref<384x128xf32, #tpu.memory_space<vmem>>, vector<384x128xf32>
    %cst_21 = arith.constant dense<0.000000e+00> : vector<16x128xf32>
    %45 = tpu.matmul %43, %44, %cst_21 {dimension_numbers = #tpu.dot_dimension_numbers<[1], [0], [0], [1], [0, 0, 1, 1], [], []>} : vector<16x384xf32>, vector<384x128xf32>, vector<16x128xf32> -> vector<16x128xf32>
    %46 = vector.broadcast %23 : vector<1x128xf32> to vector<16x128xf32>
    %47 = arith.addf %45, %46 : vector<16x128xf32>
    %48 = arith.addf %47, %0 : vector<16x128xf32>
    %cst_22 = arith.constant 0.000000e+00 : f32
    %49 = vector.broadcast %cst_22 : f32 to vector<16x128xf32>
    %50 = arith.maximumf %48, %49 : vector<16x128xf32>
    %c0_23 = arith.constant 0 : index
    %c0_24 = arith.constant 0 : index
    %51 = vector.load %arg5[%c0_23, %c0_24] : memref<16x128xf32, #tpu.memory_space<vmem>>, vector<16x128xf32>
    tpu.vector_store %arg5[%c0_23, %c0_24], %50 {strides = array<i32>} : memref<16x128xf32, #tpu.memory_space<vmem>>, vector<16x128xf32>,
    return
  }
  func.func @transform_0(%arg0: i32) -> (i32, i32) {
    %c0_i32 = arith.constant 0 : i32
    %c0_i32_0 = arith.constant 0 : i32
    return %arg0, %c0_i32 : i32, i32
  }
  func.func @transform_1(%arg0: i32) -> (i32, i32) {
    %c0_i32 = arith.constant 0 : i32
    %c0_i32_0 = arith.constant 0 : i32
    %c0_i32_1 = arith.constant 0 : i32
    return %c0_i32, %c0_i32_0 : i32, i32
  }
  func.func @transform_2(%arg0: i32) -> (i32, i32) {
    %c0_i32 = arith.constant 0 : i32
    %c0_i32_0 = arith.constant 0 : i32
    %c0_i32_1 = arith.constant 0 : i32
    return %c0_i32, %c0_i32_0 : i32, i32
  }
  func.func @transform_3(%arg0: i32) -> (i32, i32) {
    %c0_i32 = arith.constant 0 : i32
    %c0_i32_0 = arith.constant 0 : i32
    %c0_i32_1 = arith.constant 0 : i32
    return %c0_i32, %c0_i32_0 : i32, i32
  }
  func.func @transform_4(%arg0: i32) -> (i32, i32) {
    %c0_i32 = arith.constant 0 : i32
    %c0_i32_0 = arith.constant 0 : i32
    return %arg0, %c0_i32 : i32, i32
  }
}

</mosaic_0001>

<bundles_post_ra>
// kernel: tpu_custom_call.1
= control target key start
LH: loop header
LB: loop body
LE: loop exit
PB: predicated region body
PF: predicated region fallthrough
CT: control target
= control target key end

     0   :  { %9 = vsyncpa [#allocation3], 0  ;;  %s941_s0 = inlined_call_operand.hbm [shape: f32[16,128], index: 0, kind: input, shape index: {}]   ;;  %s942_s1 = inlined_call_operand.hbm [shape: f32[384,128], index: 1, kind: input, shape index: {}]   ;;  %s943_s2 = inlined_call_operand.hbm [shape: f32[384,128], index: 2, kind: input, shape index: {}]   ;;  %s944_s3 = inlined_call_operand.vmem [shape: f32[2,128], index: 3, kind: input, shape index: {}]   ;;  %s945_s4 = inlined_call_operand.hbm [shape: f32[16,128], index: 4, kind: output, shape index: {}]  }
   0x1   :  { %10 = vsyncpa [#allocation6], 0 }
   0x2   :  { %11 = vsyncpa [#allocation4], 0  ;;  %s830_s15 = smov [#allocation5]   ;;  %s831_s17 = smov [#allocation2]  }
   0x3   :  { %s29_s16 = sshll.u32 %s830_s15, 4  ;;  %s17_s18 = sshll.u32 %s831_s17, 4  ;;  %s30_s16 = int_to_ptr.vmem [resolvable:$true] %s29_s16  ;;  %s18_s18 = int_to_ptr.vmem [resolvable:$true] %s17_s18 }
   0x4   :  { %s752_s19 = scalar_lea.vmem %s30_s16, 6144  ;;  %p757_p1 = scmp.lt.s32.totalorder %s30_s16, %s30_s16 }
   0x5   :  { %p753_p0 = scmp.ne.s32.totalorder %s30_s16, %s752_s19  ;;  %p758_p2 = scmp.lt.s32.totalorder %s752_s19, %s752_s19 }
   0x7   :  { %p759_p3 = por %p758_p2, %p757_p1 }
   0x9   :  { %p760_p4 = pnand %p759_p3, %p753_p0 }
   0xb   :  { %763 = shalt.err (!%p760_p4)
}
   0xc   :  { %s832_s20 = smov 128   ;;  %s833_s21 = smov 8  }
   0xd   :  { %35 = dma.hbm_to_vmem [thread:$0]  %s942_s1, 6144, %s30_s16, [#allocation6], %s832_s20, %s832_s20, %s833_s21  }
   0xe   :  { %s772_s24 = scalar_lea.vmem %s18_s18, 256  ;;  %p777_p6 = scmp.lt.s32.totalorder %s18_s18, %s18_s18 }
   0xf   :  { %p773_p5 = scmp.ne.s32.totalorder %s18_s18, %s772_s24  ;;  %p778_p7 = scmp.lt.s32.totalorder %s772_s24, %s772_s24 }
  0x11   :  { %p779_p8 = por %p778_p7, %p777_p6 }
  0x13   :  { %p780_p9 = pnand %p779_p8, %p773_p5 }
  0x15   :  { %783 = shalt.err (!%p780_p9)
}
  0x16   :  { %23 = dma.hbm_to_vmem [thread:$0]  %s941_s0, 256, %s18_s18, [#allocation3], %s832_s20, %s832_s20, %s833_s21  }
  0x17   :  { %s834_s27 = smov [#allocation7]  }
  0x18   :  { %s41_s28 = sshll.u32 %s834_s27, 4  ;;  %s42_s28 = int_to_ptr.vmem [resolvable:$true] %s41_s28 }
  0x19   :  { %s792_s29 = scalar_lea.vmem %s42_s28, 6144  ;;  %p797_p11 = scmp.lt.s32.totalorder %s42_s28, %s42_s28 }
  0x1a   :  { %p793_p10 = scmp.ne.s32.totalorder %s42_s28, %s792_s29  ;;  %p798_p12 = scmp.lt.s32.totalorder %s792_s29, %s792_s29 }
  0x1c   :  { %p799_p13 = por %p798_p12, %p797_p11 }
  0x1e   :  { %p800_p0 = pnand %p799_p13, %p793_p10 }
  0x20   :  { %803 = shalt.err (!%p800_p0)
}
  0x21   :  { %47 = dma.hbm_to_vmem [thread:$0]  %s943_s2, 6144, %s42_s28, [#allocation6], %s832_s20, %s832_s20, %s833_s21  }
  0x22   :  { %824 = dma.done.wait [#allocation3], 256  }
  0x23   :  { %825 = vsyncadd [#allocation3], 4294967040 }
  0x24   :  { %826 = dma.done.wait [#allocation6], 12288  }
  0x25   :  { %827 = vsyncadd [#allocation6], 4294955008  ;;  %v139_v0 = vld [vmem:[#allocation5 + $0xf8] sm:$0xff]  ;;  %v138_v2 = vld [vmem:[#allocation5 + $0xf0] sm:$0xff]  ;;  %v61_v31 = vlaneseq  ;;  %s835_s7 = smov [#allocation8]  }
  0x26   :  { %v123_v1 = vld [vmem:[#allocation5 + $0x78] sm:$0xff]  ;;  %556 = vmatprep.subr.mxu0 %v139_v0  ;;  %v122_v3 = vld [vmem:[#allocation5 + $0x70] sm:$0xff]  ;;  %v137_v5 = vld [vmem:[#allocation5 + $0xe8] sm:$0xff]  ;;  %s537_s8 = sshll.u32 %s835_s7, 4  ;;  %s538_s8 = int_to_ptr.vmem [resolvable:$true] %s537_s8 }
  0x27   :  { %v155_v4 = vld [vmem:[#allocation5 + $0x178] sm:$0xff]  ;;  %557 = vmatpush3.msra.mxu0 %v123_v1  ;;  %v154_v6 = vld [vmem:[#allocation5 + $0x170] sm:$0xff]  ;;  %v121_v7 = vld [vmem:[#allocation5 + $0x68] sm:$0xff]  ;;  %v879_v39 = vshrl.u32 %v61_v31, 7  ;;  %p809_p2 = scmp.lt.s32.totalorder %s538_s8, %s538_s8 }
  0x28   :  { %668 = vmatprep.subr.mxu1 %v155_v4  ;;  %558 = vmatprep.subr.mxu0 %v138_v2  ;;  %v153_v8 = vld [vmem:[#allocation5 + $0x168] sm:$0xff]  ;;  %v136_v9 = vld [vmem:[#allocation5 + $0xe0] sm:$0xff]  ;;  %v135_v12 = vld [vmem:[#allocation5 + $0xd8] sm:$0xff] }
  0x29   :  { %669 = vmatpush3.msra.mxu1 %v155_v4  ;;  %559 = vmatpush3.msra.mxu0 %v122_v3  ;;  %v120_v10 = vld [vmem:[#allocation5 + $0x60] sm:$0xff]  ;;  %v119_v13 = vld [vmem:[#allocation5 + $0x58] sm:$0xff]  ;;  %v134_v15 = vld [vmem:[#allocation5 + $0xd0] sm:$0xff]  ;;  %v63_v46 = vadd.s32 8, %v879_v39  ;;  %v68_v49 = vand.u32 15, %v879_v39  ;;  %vm96_vm0 = vcmp.lt.s32.totalorder %v879_v39, 1 }
  0x2a   :  { %670 = vmatprep.subr.mxu1 %v154_v6  ;;  %560 = vmatprep.subr.mxu0 %v137_v5  ;;  %v152_v11 = vld [vmem:[#allocation5 + $0x160] sm:$0xff]  ;;  %v151_v14 = vld [vmem:[#allocation5 + $0x158] sm:$0xff]  ;;  %v118_v16 = vld [vmem:[#allocation5 + $0x50] sm:$0xff]  ;;  %vm103_vm1 = vcmp.lt.s32.totalorder %v879_v39, 7 }
  0x2b   :  { %671 = vmatpush3.msra.mxu1 %v154_v6  ;;  %561 = vmatpush3.msra.mxu0 %v121_v7  ;;  %v150_v17 = vld [vmem:[#allocation5 + $0x150] sm:$0xff]  ;;  %v133_v18 = vld [vmem:[#allocation5 + $0xc8] sm:$0xff]  ;;  %v132_v21 = vld [vmem:[#allocation5 + $0xc0] sm:$0xff]  ;;  %v75_v57 = vand.u32 15, %v63_v46  ;;  %vm894_vm2 = vcmp.ne.s32.totalorder %v68_v49, 0 }
  0x2c   :  { %672 = vmatprep.subr.mxu1 %v153_v8  ;;  %562 = vmatprep.subr.mxu0 %v136_v9  ;;  %v117_v19 = vld [vmem:[#allocation5 + $0x48] sm:$0xff]  ;;  %v116_v22 = vld [vmem:[#allocation5 + $0x40] sm:$0xff]  ;;  %v131_v24 = vld [vmem:[#allocation5 + $0xb8] sm:$0xff] }
  0x2d   :  { %673 = vmatpush3.msra.mxu1 %v153_v8  ;;  %563 = vmatpush3.msra.mxu0 %v120_v10  ;;  %v149_v20 = vld [vmem:[#allocation5 + $0x148] sm:$0xff]  ;;  %v148_v23 = vld [vmem:[#allocation5 + $0x140] sm:$0xff]  ;;  %v115_v25 = vld [vmem:[#allocation5 + $0x38] sm:$0xff]  ;;  %vm904_vm3 = vcmp.ne.s32.totalorder %v75_v57, 15 }
  0x2e   :  { %674 = vmatprep.subr.mxu1 %v152_v11  ;;  %564 = vmatprep.subr.mxu0 %v135_v12  ;;  %v147_v26 = vld [vmem:[#allocation5 + $0x138] sm:$0xff]  ;;  %v130_v27 = vld [vmem:[#allocation5 + $0xb0] sm:$0xff]  ;;  %v129_v30 = vld [vmem:[#allocation5 + $0xa8] sm:$0xff] }
  0x2f   :  { %675 = vmatpush3.msra.mxu1 %v152_v11  ;;  %565 = vmatpush3.msra.mxu0 %v119_v13  ;;  %v114_v28 = vld [vmem:[#allocation5 + $0x30] sm:$0xff]  ;;  %v113_v32 = vld [vmem:[#allocation5 + $0x28] sm:$0xff]  ;;  %v128_v34 = vld [vmem:[#allocation5 + $0xa0] sm:$0xff] }
  0x30   :  { %676 = vmatprep.subr.mxu1 %v151_v14  ;;  %566 = vmatprep.subr.mxu0 %v134_v15  ;;  %v146_v29 = vld [vmem:[#allocation5 + $0x130] sm:$0xff]  ;;  %v145_v33 = vld [vmem:[#allocation5 + $0x128] sm:$0xff]  ;;  %v112_v35 = vld [vmem:[#allocation5 + $0x20] sm:$0xff] }
  0x31   :  { %677 = vmatpush3.msra.mxu1 %v151_v14  ;;  %567 = vmatpush3.msra.mxu0 %v118_v16  ;;  %v144_v36 = vld [vmem:[#allocation5 + $0x120] sm:$0xff]  ;;  %v127_v37 = vld [vmem:[#allocation5 + $0x98] sm:$0xff]  ;;  %v881_v41 = vld [vmem:[#allocation2] sm:$0xff] }
  0x32   :  { %678 = vmatprep.subr.mxu1 %v150_v17  ;;  %568 = vmatprep.subr.mxu0 %v133_v18  ;;  %v111_v38 = vld [vmem:[#allocation5 + $0x18] sm:$0xff]  ;;  %v126_v43 = vld [vmem:[#allocation5 + $0x90] sm:$0xff]  ;;  %v125_v47 = vld [vmem:[#allocation5 + $0x88] sm:$0xff]  ;;  %v94_v48 = vrot.slane %v881_v41, 7  ;;  %v101_v54 = vrot.slane %v881_v41, 1 }
  0x33   :  { %679 = vmatpush3.msra.mxu1 %v150_v17  ;;  %569 = vmatpush3.msra.mxu0 %v117_v19  ;;  %v143_v40 = vld [vmem:[#allocation5 + $0x118] sm:$0xff]  ;;  %v110_v44 = vld [vmem:[#allocation5 + $0x10] sm:$0xff]  ;;  %v109_v51 = vld [vmem:[#allocation5 + $0x8] sm:$0xff] }
  0x34   :  { %680 = vmatprep.subr.mxu1 %v149_v20  ;;  %570 = vmatprep.subr.mxu0 %v132_v21  ;;  %v883_v42 = vld [vmem:[#allocation2 + $0x8] sm:$0xff]  ;;  %v142_v45 = vld [vmem:[#allocation5 + $0x110] sm:$0xff]  ;;  %v124_v52 = vld [vmem:[#allocation5 + $0x80] sm:$0xff] }
  0x35   :  { %681 = vmatpush3.msra.mxu1 %v149_v20  ;;  %571 = vmatpush3.msra.mxu0 %v116_v22  ;;  %v95_v50 = vrot.slane %v883_v42, 7  ;;  %v141_v53 = vld [vmem:[#allocation5 + $0x108] sm:$0xff]  ;;  %v102_v55 = vrot.slane %v883_v42, 1  ;;  %v108_v56 = vld [vmem:[#allocation5] sm:$0xff]  ;;  %v355_v62 = vld [vmem:[#allocation7 + $0xf8] sm:$0xff] }
  0x36   :  { %682 = vmatprep.subr.mxu1 %v148_v23  ;;  %572 = vmatprep.subr.mxu0 %v131_v24  ;;  %v140_v60 = vld [vmem:[#allocation5 + $0x100] sm:$0xff]  ;;  %v339_v1 = vld [vmem:[#allocation7 + $0x78] sm:$0xff]  ;;  %v354_v4 = vld [vmem:[#allocation7 + $0xf0] sm:$0xff] }
  0x37   :  { %683 = vmatpush3.msra.mxu1 %v148_v23  ;;  %573 = vmatpush3.msra.mxu0 %v115_v25  ;;  %v98_v59 = vsel %vm96_vm0, %v95_v50, %v94_v48  ;;  %v104_v61 = vsel %vm103_vm1, %v101_v54, %v102_v55  ;;  %v105_v0 = vsel %vm103_vm1, %v102_v55, %v101_v54  ;;  %v371_v3 = vld [vmem:[#allocation7 + $0x178] sm:$0xff]  ;;  %v338_v5 = vld [vmem:[#allocation7 + $0x70] sm:$0xff]  ;;  %v353_v7 = vld [vmem:[#allocation7 + $0xe8] sm:$0xff] }
  0x38   :  { %684 = vmatprep.subr.mxu1 %v147_v26  ;;  %574 = vmatprep.subr.mxu0 %v130_v27  ;;  %v97_v2 = vsel %vm96_vm0, %v94_v48, %v95_v50  ;;  %v370_v6 = vld [vmem:[#allocation7 + $0x170] sm:$0xff]  ;;  %v337_v8 = vld [vmem:[#allocation7 + $0x68] sm:$0xff]  ;;  %v352_v10 = vld [vmem:[#allocation7 + $0xe0] sm:$0xff] }
  0x39   :  { %685 = vmatpush3.msra.mxu1 %v147_v26  ;;  %575 = vmatpush3.msra.mxu0 %v114_v28  ;;  %v369_v9 = vld [vmem:[#allocation7 + $0x168] sm:$0xff]  ;;  %v336_v11 = vld [vmem:[#allocation7 + $0x60] sm:$0xff]  ;;  %v351_v13 = vld [vmem:[#allocation7 + $0xd8] sm:$0xff] }
  0x3a   :  { %686 = vmatprep.subr.mxu1 %v146_v29  ;;  %576 = vmatprep.subr.mxu0 %v129_v30  ;;  %v368_v12 = vld [vmem:[#allocation7 + $0x160] sm:$0xff]  ;;  %v335_v14 = vld [vmem:[#allocation7 + $0x58] sm:$0xff]  ;;  %v350_v16 = vld [vmem:[#allocation7 + $0xd0] sm:$0xff] }
  0x3b   :  { %687 = vmatpush3.msra.mxu1 %v146_v29  ;;  %577 = vmatpush3.msra.mxu0 %v113_v32  ;;  %v367_v15 = vld [vmem:[#allocation7 + $0x158] sm:$0xff]  ;;  %v334_v17 = vld [vmem:[#allocation7 + $0x50] sm:$0xff]  ;;  %v349_v19 = vld [vmem:[#allocation7 + $0xc8] sm:$0xff] }
  0x3c   :  { %688 = vmatprep.subr.mxu1 %v145_v33  ;;  %578 = vmatprep.subr.mxu0 %v128_v34  ;;  %v366_v18 = vld [vmem:[#allocation7 + $0x150] sm:$0xff]  ;;  %v333_v20 = vld [vmem:[#allocation7 + $0x48] sm:$0xff]  ;;  %v348_v22 = vld [vmem:[#allocation7 + $0xc0] sm:$0xff] }
  0x3d   :  { %689 = vmatpush3.msra.mxu1 %v145_v33  ;;  %579 = vmatpush3.msra.mxu0 %v112_v35  ;;  %v365_v21 = vld [vmem:[#allocation7 + $0x148] sm:$0xff]  ;;  %v332_v23 = vld [vmem:[#allocation7 + $0x40] sm:$0xff]  ;;  %v347_v25 = vld [vmem:[#allocation7 + $0xb8] sm:$0xff] }
  0x3e   :  { %690 = vmatprep.subr.mxu1 %v144_v36  ;;  %580 = vmatprep.subr.mxu0 %v127_v37  ;;  %v364_v24 = vld [vmem:[#allocation7 + $0x140] sm:$0xff]  ;;  %v331_v26 = vld [vmem:[#allocation7 + $0x38] sm:$0xff]  ;;  %v346_v28 = vld [vmem:[#allocation7 + $0xb0] sm:$0xff] }
  0x3f   :  { %691 = vmatpush3.msra.mxu1 %v144_v36  ;;  %581 = vmatpush3.msra.mxu0 %v111_v38  ;;  %v363_v27 = vld [vmem:[#allocation7 + $0x138] sm:$0xff]  ;;  %v330_v29 = vld [vmem:[#allocation7 + $0x30] sm:$0xff]  ;;  %v345_v31 = vld [vmem:[#allocation7 + $0xa8] sm:$0xff] }
  0x40   :  { %692 = vmatprep.subr.mxu1 %v143_v40  ;;  %582 = vmatprep.subr.mxu0 %v126_v43  ;;  %v362_v30 = vld [vmem:[#allocation7 + $0x130] sm:$0xff]  ;;  %v329_v32 = vld [vmem:[#allocation7 + $0x28] sm:$0xff]  ;;  %v344_v34 = vld [vmem:[#allocation7 + $0xa0] sm:$0xff] }
  0x41   :  { %693 = vmatpush3.msra.mxu1 %v143_v40  ;;  %583 = vmatpush3.msra.mxu0 %v110_v44  ;;  %v361_v33 = vld [vmem:[#allocation7 + $0x128] sm:$0xff]  ;;  %v328_v35 = vld [vmem:[#allocation7 + $0x20] sm:$0xff]  ;;  %v343_v37 = vld [vmem:[#allocation7 + $0x98] sm:$0xff] }
  0x42   :  { %694 = vmatprep.subr.mxu1 %v142_v45  ;;  %584 = vmatprep.subr.mxu0 %v125_v47  ;;  %v360_v36 = vld [vmem:[#allocation7 + $0x120] sm:$0xff]  ;;  %v327_v38 = vld [vmem:[#allocation7 + $0x18] sm:$0xff]  ;;  %v342_v43 = vld [vmem:[#allocation7 + $0x90] sm:$0xff] }
  0x43   :  { %224 = vmatprep.mubr.f32.mxu0 %v881_v41  ;;  %585 = vmatpush3.msra.mxu0 %v109_v51  ;;  %v359_v40 = vld [vmem:[#allocation7 + $0x118] sm:$0xff]  ;;  %v326_v44 = vld [vmem:[#allocation7 + $0x10] sm:$0xff]  ;;  %v341_v46 = vld [vmem:[#allocation7 + $0x88] sm:$0xff] }
  0x44   :  { %695 = vmatpush3.msra.mxu1 %v142_v45  ;;  %586 = vmatprep.subr.mxu0 %v124_v52  ;;  %v358_v45 = vld [vmem:[#allocation7 + $0x110] sm:$0xff]  ;;  %v325_v47 = vld [vmem:[#allocation7 + $0x8] sm:$0xff]  ;;  %v340_v49 = vld [vmem:[#allocation7 + $0x80] sm:$0xff] }
  0x45   :  { %696 = vmatprep.subr.mxu1 %v141_v53  ;;  %587 = vmatpush3.msra.mxu0 %v108_v56  ;;  %v357_v48 = vld [vmem:[#allocation7 + $0x108] sm:$0xff]  ;;  %v324_v50 = vld [vmem:[#allocation7] sm:$0xff]  ;;  %v550_v54 = vld [vmem:[%s944_s3] ss:$0 sm:$0xff] }
  0x46   :  { %697 = vmatpush3.msra.mxu1 %v141_v53  ;;  %551 = vmatmul.mubr.msk.f32.vlgmr.msra.gmra.mxu0 %vm894_vm2, %v98_v59  ;;  %v356_v51 = vld [vmem:[#allocation7 + $0x100] sm:$0xff] }
  0x47   :  { %698 = vmatprep.subr.mxu1 %v140_v60  ;;  %229 = vmatprep.mubr.f32.mxu0 %v883_v42 }
  0x48   :  { %699 = vmatpush3.msra.mxu1 %v140_v60  ;;  %700 = vmatprep.mubr.f32.mxu1 %v104_v61 }
  0x49   :  { %612 = vmatprep.subr.mxu0 %v355_v62  ;;  %701 = vmatmul.mubr.msk.f32.vlgmr.msra.gmra.mxu1 %vm904_vm3, %v105_v0 }
  0x4a   :  { %613 = vmatpush3.msra.mxu0 %v339_v1  ;;  %703 = vmatprep.subr.mxu1 %v371_v3 }
  0x4b   :  { %230 = vmatmul.mubr.f32.gmra.mxu0 %v97_v2  ;;  %614 = vmatprep.subr.mxu0 %v354_v4 }
  0x4c   :  { %704 = vmatpush3.msra.mxu1 %v371_v3  ;;  %615 = vmatpush3.msra.mxu0 %v338_v5 }
  0x4d   :  { %705 = vmatprep.subr.mxu1 %v370_v6  ;;  %616 = vmatprep.subr.mxu0 %v353_v7 }
  0x4e   :  { %706 = vmatpush3.msra.mxu1 %v370_v6  ;;  %617 = vmatpush3.msra.mxu0 %v337_v8 }
  0x4f   :  { %707 = vmatprep.subr.mxu1 %v369_v9  ;;  %618 = vmatprep.subr.mxu0 %v352_v10 }
  0x50   :  { %708 = vmatpush3.msra.mxu1 %v369_v9  ;;  %619 = vmatpush3.msra.mxu0 %v336_v11 }
  0x51   :  { %709 = vmatprep.subr.mxu1 %v368_v12  ;;  %620 = vmatprep.subr.mxu0 %v351_v13 }
  0x52   :  { %710 = vmatpush3.msra.mxu1 %v368_v12  ;;  %621 = vmatpush3.msra.mxu0 %v335_v14 }
  0x53   :  { %711 = vmatprep.subr.mxu1 %v367_v15  ;;  %622 = vmatprep.subr.mxu0 %v350_v16  ;;  %v553_v16 = vld [vmem:[%s944_s3 + $0x1] ss:$0 sm:$0xff]  ;;  %s804_s3 = scalar_lea.vmem %s538_s8, 256 }
  0x54   :  { %712 = vmatpush3.msra.mxu1 %v367_v15  ;;  %623 = vmatpush3.msra.mxu0 %v334_v17  ;;  %p805_p1 = scmp.ne.s32.totalorder %s538_s8, %s804_s3  ;;  %p810_p3 = scmp.lt.s32.totalorder %s804_s3, %s804_s3 }
  0x55   :  { %713 = vmatprep.subr.mxu1 %v366_v18  ;;  %624 = vmatprep.subr.mxu0 %v349_v19 }
  0x56   :  { %714 = vmatpush3.msra.mxu1 %v366_v18  ;;  %625 = vmatpush3.msra.mxu0 %v333_v20  ;;  %p811_p4 = por %p810_p3, %p809_p2 }
  0x57   :  { %715 = vmatprep.subr.mxu1 %v365_v21  ;;  %626 = vmatprep.subr.mxu0 %v348_v22 }
  0x58   :  { %716 = vmatpush3.msra.mxu1 %v365_v21  ;;  %627 = vmatpush3.msra.mxu0 %v332_v23  ;;  %p812_p5 = pnand %p811_p4, %p805_p1 }
  0x59   :  { %717 = vmatprep.subr.mxu1 %v364_v24  ;;  %628 = vmatprep.subr.mxu0 %v347_v25 }
  0x5a   :  { %718 = vmatpush3.msra.mxu1 %v364_v24  ;;  %629 = vmatpush3.msra.mxu0 %v331_v26 }
  0x5b   :  { %719 = vmatprep.subr.mxu1 %v363_v27  ;;  %630 = vmatprep.subr.mxu0 %v346_v28 }
  0x5c   :  { %720 = vmatpush3.msra.mxu1 %v363_v27  ;;  %631 = vmatpush3.msra.mxu0 %v330_v29 }
  0x5d   :  { %721 = vmatprep.subr.mxu1 %v362_v30  ;;  %632 = vmatprep.subr.mxu0 %v345_v31 }
  0x5e   :  { %722 = vmatpush3.msra.mxu1 %v362_v30  ;;  %633 = vmatpush3.msra.mxu0 %v329_v32 }
  0x5f   :  { %723 = vmatprep.subr.mxu1 %v361_v33  ;;  %634 = vmatprep.subr.mxu0 %v344_v34 }
  0x60   :  { %724 = vmatpush3.msra.mxu1 %v361_v33  ;;  %635 = vmatpush3.msra.mxu0 %v328_v35 }
  0x61   :  { %725 = vmatprep.subr.mxu1 %v360_v36  ;;  %636 = vmatprep.subr.mxu0 %v343_v37 }
  0x62   :  { %726 = vmatpush3.msra.mxu1 %v360_v36  ;;  %637 = vmatpush3.msra.mxu0 %v327_v38 }
  0x63   :  { %727 = vmatprep.subr.mxu1 %v359_v40  ;;  %638 = vmatprep.subr.mxu0 %v342_v43 }
  0x64   :  { %728 = vmatpush3.msra.mxu1 %v359_v40  ;;  %639 = vmatpush3.msra.mxu0 %v326_v44 }
  0x65   :  { %729 = vmatprep.subr.mxu1 %v358_v45  ;;  %640 = vmatprep.subr.mxu0 %v341_v46 }
  0x66   :  { %730 = vmatpush3.msra.mxu1 %v358_v45  ;;  %641 = vmatpush3.msra.mxu0 %v325_v47 }
  0x67   :  { %731 = vmatprep.subr.mxu1 %v357_v48  ;;  %642 = vmatprep.subr.mxu0 %v340_v49 }
  0x68   :  { %732 = vmatpush3.msra.mxu1 %v357_v48  ;;  %643 = vmatpush3.msra.mxu0 %v324_v50 }
  0x69   :  { %733 = vmatprep.subr.mxu1 %v356_v51 }
  0x6a   :  { %734 = vmatpush3.msra.mxu1 %v356_v51 }
 0x106   :  { %v588_v52 = vpop.f32.mrf.mxu0 }
 0x108   :  { %v589_v53 = vpop.f32.mrf.mxu0 }
 0x109   :  { %v590_v55 = vadd.f32 %v589_v53, %v588_v52  ;;  %v702_v56 = vpop.f32.mrf.mxu1 }
 0x10b   :  { %v591_v57 = vpop.f32.mrf.mxu0  ;;  %v227_v59 = vadd.f32 %v590_v55, %v550_v54  ;;  %v301_v60 = vpop.f32.mrf.mxu1 }
 0x10d   :  { %v592_v61 = vpop.f32.mrf.mxu0  ;;  %v302_v0 = vadd.f32 %v301_v60, %v227_v59 }
 0x10e   :  { %v593_v62 = vadd.f32 %v592_v61, %v591_v57 }
 0x10f   :  { %v310_v2 = vmax.f32 %v302_v0, 0.0 }
 0x110   :  { %v232_v1 = vadd.f32 %v593_v62, %v550_v54 }
 0x111   :  { %440 = vmatprep.mubr.f32.mxu0 %v310_v2  ;;  %v312_v6 = vrot.slane %v310_v2, 7  ;;  %v318_v7 = vrot.slane %v310_v2, 1 }
 0x112   :  { %v307_v3 = vadd.f32 %v702_v56, %v232_v1 }
 0x114   :  { %v311_v4 = vmax.f32 %v307_v3, 0.0 }
 0x116   :  { %v313_v5 = vrot.slane %v311_v4, 7  ;;  %v319_v8 = vrot.slane %v311_v4, 1 }
 0x118   :  { %v315_v9 = vsel %vm96_vm0, %v313_v5, %v312_v6  ;;  %v320_v10 = vsel %vm103_vm1, %v318_v7, %v319_v8  ;;  %v321_v11 = vsel %vm103_vm1, %v319_v8, %v318_v7  ;;  %v314_v12 = vsel %vm96_vm0, %v312_v6, %v313_v5 }
 0x119   :  { %554 = vmatmul.mubr.msk.f32.vlgmr.msra.gmra.mxu0 %vm894_vm2, %v315_v9  ;;  %735 = vmatprep.mubr.f32.mxu1 %v320_v10 }
 0x11a   :  { %445 = vmatprep.mubr.f32.mxu0 %v311_v4  ;;  %736 = vmatmul.mubr.msk.f32.vlgmr.msra.gmra.mxu1 %vm904_vm3, %v321_v11 }
 0x11d   :  { %446 = vmatmul.mubr.f32.gmra.mxu0 %v314_v12 }
 0x1d9   :  { %v644_v13 = vpop.f32.mrf.mxu0 }
 0x1da   :  { %v737_v14 = vpop.f32.mrf.mxu1 }
 0x1db   :  { %v645_v15 = vpop.f32.mrf.mxu0 }
 0x1dc   :  { %v646_v17 = vadd.f32 %v645_v15, %v644_v13  ;;  %v517_v19 = vpop.f32.mrf.mxu1 }
 0x1dd   :  { %v647_v18 = vpop.f32.mrf.mxu0 }
 0x1de   :  { %v443_v58 = vadd.f32 %v646_v17, %v553_v16 }
 0x1df   :  { %v648_v20 = vpop.f32.mrf.mxu0 }
 0x1e0   :  { %v518_v21 = vadd.f32 %v517_v19, %v443_v58  ;;  %v649_v22 = vadd.f32 %v648_v20, %v647_v18 }
 0x1e2   :  { %v526_v63 = vadd.f32 %v518_v21, %v881_v41  ;;  %v448_v23 = vadd.f32 %v649_v22, %v553_v16 }
 0x1e4   :  { %v528_v39 = vmax.f32 %v526_v63, 0.0  ;;  %v523_v24 = vadd.f32 %v737_v14, %v448_v23 }
 0x1e6   :  { %530 = vst [vmem:[#allocation8] sm:$0xff] %v528_v39  ;;  %v527_v25 = vadd.f32 %v523_v24, %v883_v42 }
 0x1e8   :  { %v529_v26 = vmax.f32 %v527_v25, 0.0 }
 0x1ea   :  { %531 = vst [vmem:[#allocation8 + $0x8] sm:$0xff] %v529_v26 }
 0x1eb   :  { %815 = shalt.err (!%p812_p5)
}
 0x1ec   :  { %543 = dma.vmem_to_hbm [thread:$0]  %s538_s8, 256, %s945_s4, [#allocation4], %s832_s20, %s832_s20, %s833_s21  }
 0x1ed   :  { %828 = dma.done.wait [#allocation4], 256  }
 0x1ee   :  { %829 = vsyncadd [#allocation4], 4294967040 }
 0x1ef   :  { %547 = vsyncpa [#allocation3], 1 }
 0x1f0   :  { %548 = vsyncpa [#allocation6], 1 }
 0x1f1   :  { %549 = vsyncpa [#allocation4], 1 }

</bundles_post_ra>
